<compile_context>
chip_gen: v7x
topology: tpu7x:2x2x1
jax: 0.10.0
libtpu: 0.0.40
codegen_flags: <defaults>
</compile_context>

<pallas_src>
import numpy as np
import jax
import jax.numpy as jnp
from jax.experimental import pallas as pl
from jax.experimental.pallas import tpu as pltpu

NUM_JOINTS = 5
POSE_FEAT = 36   # 4 joints * 9 (rot mat - I) == posedirs.shape[1]
JP = 8           # joints padded to one sublane group


# ----------------------------------------------------------------------------
# Fused Pallas kernel: blendshapes + LBS skinning + translation, tiled over Vp
# ----------------------------------------------------------------------------
def _fused_blend_skin_kernel(se_ref, pf_ref, a_ref, t_ref, vt_ref,
                             dse_ref, dp_ref, wt_ref, o_ref):
    # se_ref  : (B, SE)        shape+expression params (constant block)
    # pf_ref  : (B, 36)        pose feature             (constant block)
    # a_ref   : (B, 12, JP)    packed skinning transforms, row = 3*w + h
    # t_ref   : (B, 3, 1)      translation
    # vt_ref  : (3, TN)        template column tile (component-planar)
    # dse_ref : (3, SE, TN)    stacked [shapedirs; expressedirs] column tile
    # dp_ref  : (3, 36, TN)    posedirs column tile
    # wt_ref  : (JP, TN)       skinning weights (transposed, joint-padded)
    # o_ref   : (B, 3, TN)     posed vertices
    se = se_ref[...]
    pf = pf_ref[...]
    w = wt_ref[...]
    vt = vt_ref[...]
    a = a_ref[...]
    B = se.shape[0]

    # Blendshapes, one lane-dense (B, SE)@(SE, TN) matmul per component.
    v = []
    for c in range(3):
        v.append(vt[c:c + 1, :]
                 + jnp.dot(se, dse_ref[c], preferred_element_type=jnp.float32)
                 + jnp.dot(pf, dp_ref[c], preferred_element_type=jnp.float32))
    vx, vy, vz = v                                     # each (B, TN) f32

    # LBS skinning + translation, unrolled over the (small, static) batch.
    for b in range(B):
        G = jnp.dot(a[b], w, preferred_element_type=jnp.float32)   # (12, TN)
        out = (G[0:3, :] * vx[b:b + 1, :]
               + G[3:6, :] * vy[b:b + 1, :]
               + G[6:9, :] * vz[b:b + 1, :]
               + G[9:12, :]
               + t_ref[b])                                          # (3, TN)
        o_ref[b] = out


def fused_blend_skin(se, pf, a_rows, t3, vt3, dse3, dp3, wt, tile):
    B, SE = se.shape
    P = pf.shape[1]
    Vp = vt3.shape[1]
    nv = Vp // tile
    dsz = jnp.dtype(dse3.dtype).itemsize

    # Per-step VMEM footprint (pipelined blocks double-buffer); clamp to 64 MiB
    # which is safe on all generations (v7x physical VMEM is 64 MiB).
    step_bytes = ((3 * SE + 3 * P) * tile * dsz
                  + (3 + JP + B * 3) * tile * 4
                  + (B * SE + B * P + B * 12 * JP + B * 3) * 4)
    vmem_limit = int(min(64 * 1024 * 1024,
                         max(32 * 1024 * 1024, 3 * step_bytes + (8 << 20))))

    return pl.pallas_call(
        _fused_blend_skin_kernel,
        out_shape=jax.ShapeDtypeStruct((B, 3, Vp), jnp.float32),
        grid=(nv,),
        in_specs=[
            pl.BlockSpec((B, SE), lambda n: (0, 0)),
            pl.BlockSpec((B, P), lambda n: (0, 0)),
            pl.BlockSpec((B, 12, JP), lambda n: (0, 0, 0)),
            pl.BlockSpec((B, 3, 1), lambda n: (0, 0, 0)),
            pl.BlockSpec((3, tile), lambda n: (0, n)),
            pl.BlockSpec((3, SE, tile), lambda n: (0, 0, n)),
            pl.BlockSpec((3, P, tile), lambda n: (0, 0, n)),
            pl.BlockSpec((JP, tile), lambda n: (0, n)),
        ],
        out_specs=pl.BlockSpec((B, 3, tile), lambda n: (0, 0, n)),
        compiler_params=pltpu.CompilerParams(
            dimension_semantics=("parallel",),
            vmem_limit_bytes=vmem_limit),
    )(se, pf, a_rows, t3, vt3, dse3, dp3, wt)


# ----------------------------------------------------------------------------
# Plain-JAX glue: tiny 5-joint math
# ----------------------------------------------------------------------------
def batch_rodrigues(rot_vecs, epsilon=1e-8):
    angle = jnp.linalg.norm(rot_vecs + epsilon, axis=1, keepdims=True)   # (B,1)
    rot_dir = rot_vecs / angle
    cos = jnp.cos(angle)[:, :, None]
    sin = jnp.sin(angle)[:, :, None]
    rx, ry, rz = rot_dir[:, 0], rot_dir[:, 1], rot_dir[:, 2]
    zeros = jnp.zeros_like(rx)
    K = jnp.stack([zeros, -rz, ry, rz, zeros, -rx, -ry, rx, zeros],
                  axis=1).reshape(-1, 3, 3)
    ident = jnp.eye(3, dtype=rot_vecs.dtype)[None]
    return ident + sin * K + (1.0 - cos) * jnp.matmul(K, K)


def _transform_mat(R, t):
    top = jnp.concatenate([R, t], axis=-1)                               # (...,3,4)
    bot = jnp.broadcast_to(jnp.array([0.0, 0.0, 0.0, 1.0], R.dtype),
                           top.shape[:-2] + (1, 4))
    return jnp.concatenate([top, bot], axis=-2)                          # (...,4,4)


def batch_rigid_transform(rot_mats, joints, parents):
    Jn = joints.shape[1]
    joints_e = joints[..., None]                                         # (B,J,3,1)
    rel = jnp.concatenate(
        [joints_e[:, :1],
         joints_e[:, 1:] - joints_e[:, np.asarray(parents[1:])]], axis=1)
    T = _transform_mat(rot_mats, rel)                                    # (B,J,4,4)
    chain = [T[:, 0]]
    for i in range(1, Jn):
        chain.append(jnp.matmul(chain[int(parents[i])], T[:, i]))
    transforms = jnp.stack(chain, axis=1)
    posed_joints = transforms[:, :, :3, 3]
    R = transforms[:, :, :3, :3]
    t = posed_joints[..., None] - jnp.matmul(R, joints_e)
    A = _transform_mat(R, t)
    return posed_joints, A


# ----------------------------------------------------------------------------
# Model-init-time preparation (static topology; not per forward)
# ----------------------------------------------------------------------------
def prepare_flame(params, tile=2048, dirs_dtype=jnp.float32):
    """Precompute planar/padded direction matrices, the parameter-space joint
    regressor, and the dense landmark regressor.

    dirs_dtype=jnp.bfloat16 halves the dominant HBM weight stream for the
    bandwidth-bound blend stage (recommended for production on v5e/v6e);
    f32 accumulation is kept either way.
    """
    V = params["v_template"].shape[0]
    J = params["J_regressor"].shape[0]
    Vp = pl.cdiv(V, tile) * tile
    pad_v = Vp - V

    sd = jnp.transpose(params["shapedirs"], (1, 2, 0))       # (3, S, V)
    ed = jnp.transpose(params["expressedirs"], (1, 2, 0))    # (3, E, V)
    pd = jnp.transpose(params["posedirs"], (2, 1, 0))        # (3, 36, V)
    dse3 = jnp.pad(jnp.concatenate([sd, ed], axis=1),
                   ((0, 0), (0, 0), (0, pad_v))).astype(dirs_dtype)  # (3,SE,Vp)
    dp3 = jnp.pad(pd, ((0, 0), (0, 0), (0, pad_v))).astype(dirs_dtype)
    vt3 = jnp.pad(params["v_template"].T.astype(jnp.float32),
                  ((0, 0), (0, pad_v)))                       # (3, Vp) f32
    wt = jnp.pad(params["lbs_weights"].T.astype(jnp.float32),
                 ((0, JP - J), (0, pad_v)))                   # (JP, Vp) f32

    # Pre-project the joint regressor onto the parameters:
    #   J_rest = J_template + (concat[shape, expr] @ Jdirs).reshape(B, J, 3)
    Jreg = params["J_regressor"].astype(jnp.float32)          # (J, V)
    J_template = Jreg @ params["v_template"].astype(jnp.float32)        # (J, 3)
    Jd_s = jnp.einsum("jv,vcs->sjc", Jreg, params["shapedirs"])
    Jd_e = jnp.einsum("jv,vce->ejc", Jreg, params["expressedirs"])
    Jdirs = jnp.concatenate([Jd_s, Jd_e], axis=0).reshape(-1, J * 3)    # (SE,J*3)

    # Dense 68 x V barycentric landmark regressor (static topology).
    tri = params["faces_idx"][params["landmark_face_idx"]]    # (68, 3)
    L = tri.shape[0]
    Wlmk = jnp.zeros((L, V), jnp.float32).at[
        jnp.arange(L)[:, None], tri].add(params["landmark_b_coords"])

    return dict(V=V, Vp=Vp, J=J, tile=tile,
                dse3=dse3, dp3=dp3, vt3=vt3, wt=wt,
                J_template=J_template, Jdirs=Jdirs, Wlmk=Wlmk,
                parents=np.asarray(params["parents"]))


# ----------------------------------------------------------------------------
# FLAME forward (Pallas-backed)
# ----------------------------------------------------------------------------
def flame_forward(prep, shape_params, expression_params, pose_params,
                  eye_pose_params, jaw_pose_params, neck_pose_params, transl):
    B = shape_params.shape[0]
    V, J, tile = prep["V"], prep["J"], prep["tile"]

    # TODO(synk): rotation_6d_to_matrix branch not implemented (undefined in the
    # reference source); pose_params are 3-D axis-angle so the batch_rodrigues
    # branch of lbs() is exercised, matching the PyTorch path.
    rot_mats = jnp.stack([batch_rodrigues(pose_params),
                          batch_rodrigues(neck_pose_params),
                          batch_rodrigues(jaw_pose_params),
                          batch_rodrigues(eye_pose_params[:, :3]),
                          batch_rodrigues(eye_pose_params[:, 3:])], axis=1)
    pose_feature = (rot_mats[:, 1:5] -
                    jnp.eye(3, dtype=jnp.float32)).reshape(B, POSE_FEAT)

    se_f32 = jnp.concatenate([shape_params, expression_params],
                             axis=1).astype(jnp.float32)

    # 5-joint rest regression on parameters (pre-projected; no vertex buffer).
    J_rest = prep["J_template"][None] + (se_f32 @ prep["Jdirs"]).reshape(B, J, 3)

    # Kinematic chain over 5 joints (tiny, plain JAX).
    _, A_global = batch_rigid_transform(rot_mats, J_rest, prep["parents"])

    # Pack skinning transforms: rows ordered 3*w + h (w = matrix col, h < 3).
    A_rows = jnp.transpose(A_global[:, :, :3, :], (0, 3, 2, 1)).reshape(B, 12, J)
    A_rows = jnp.pad(A_rows, ((0, 0), (0, 0), (0, JP - J)))

    if transl is None:
        transl = jnp.zeros((B, 3), jnp.float32)

    # Fused kernel: blendshapes + LBS + translation; only posed verts hit HBM.
    se = se_f32.astype(prep["dse3"].dtype)
    pf = pose_feature.astype(prep["dp3"].dtype)
    posed = fused_blend_skin(se, pf, A_rows, transl.reshape(B, 3, 1),
                             prep["vt3"], prep["dse3"], prep["dp3"],
                             prep["wt"], tile)

    pred_planar = posed[:, :, :V]                                        # (B,3,V)
    pred_verts = jnp.transpose(pred_planar, (0, 2, 1))                   # (B,V,3)

    # 68 barycentric landmarks via precomputed dense regressor (plain XLA).
    pred_landmarks = jnp.einsum("lv,bcv->blc", prep["Wlmk"], pred_planar)
    return pred_verts, pred_landmarks


# ----------------------------------------------------------------------------
# Pure-JAX reference (mirrors the PyTorch forward) for the correctness check.
# ----------------------------------------------------------------------------
def flame_reference(params, shape_params, expression_params, pose_params,
                    eye_pose_params, jaw_pose_params, neck_pose_params, transl):
    B = shape_params.shape[0]
    V = params["v_template"].shape[0]
    v_shaped = params["v_template"][None] + jnp.einsum(
        "bS,VCS->bVC", shape_params, params["shapedirs"])
    v_expressed = v_shaped + jnp.einsum(
        "bE,VCE->bVC", expression_params, params["expressedirs"])
    J_rest = jnp.einsum("JV,BVC->BJC", params["J_regressor"], v_expressed)
    rot_mats = jnp.stack([batch_rodrigues(pose_params),
                          batch_rodrigues(neck_pose_params),
                          batch_rodrigues(jaw_pose_params),
                          batch_rodrigues(eye_pose_params[:, :3]),
                          batch_rodrigues(eye_pose_params[:, 3:])], axis=1)
    _, A = batch_rigid_transform(rot_mats, J_rest, params["parents"])
    pf = (rot_mats[:, 1:5] - jnp.eye(3, dtype=jnp.float32)).reshape(B, -1)
    v_to_skin = v_expressed + jnp.einsum("BP,VPC->BVC", pf, params["posedirs"])
    T = jnp.einsum("VJ,BJHW->BVHW", params["lbs_weights"], A)
    v_homo = jnp.concatenate(
        [v_to_skin, jnp.ones((B, V, 1), jnp.float32)], axis=2)
    v_posed = jnp.einsum("BVHW,BVW->BVH", T, v_homo)[:, :, :3]
    pred_verts = v_posed + transl[:, None]
    tri_idx = params["faces_idx"][params["landmark_face_idx"]]
    tri_verts = pred_verts[:, tri_idx]                                   # (B,68,3,3)
    lmk = jnp.einsum("blkc,lk->blc", tri_verts, params["landmark_b_coords"])
    return pred_verts, lmk


# ----------------------------------------------------------------------------
if __name__ == "__main__":
    key = jax.random.PRNGKey(0)
    B, V, S, E, Fc, L, J = 2, 300, 16, 8, 200, 68, NUM_JOINTS
    ks = jax.random.split(key, 16)

    # Deterministic synthetic "FLAME model" buffers (shapes per __init__).
    params = {
        "v_template": jax.random.normal(ks[0], (V, 3), jnp.float32) * 0.1,
        "shapedirs": jax.random.normal(ks[1], (V, 3, S), jnp.float32) * 0.01,
        "expressedirs": jax.random.normal(ks[2], (V, 3, E), jnp.float32) * 0.01,
        "posedirs": jax.random.normal(ks[3], (V, POSE_FEAT, 3), jnp.float32) * 0.01,
        "J_regressor": jax.nn.softmax(
            jax.random.normal(ks[4], (J, V), jnp.float32), axis=1),
        "lbs_weights": jax.nn.softmax(
            jax.random.normal(ks[5], (V, J), jnp.float32), axis=1),
        "faces_idx": jax.random.randint(ks[6], (Fc, 3), 0, V),
        "landmark_face_idx": jax.random.randint(ks[7], (L,), 0, Fc),
        "parents": np.array([-1, 0, 1, 1, 1], dtype=np.int64),
    }
    bc = jax.random.uniform(ks[8], (L, 3), jnp.float32, 0.1, 1.0)
    params["landmark_b_coords"] = bc / bc.sum(axis=1, keepdims=True)

    # Forward inputs.
    shape_params = jax.random.normal(ks[9], (B, S), jnp.float32) * 0.5
    expression_params = jax.random.normal(ks[10], (B, E), jnp.float32) * 0.5
    pose_params = jax.random.normal(ks[11], (B, 3), jnp.float32) * 0.2
    neck_pose = jax.random.normal(ks[12], (B, 3), jnp.float32) * 0.1
    jaw_pose = jax.random.normal(ks[13], (B, 3), jnp.float32) * 0.1
    eye_pose = jax.random.normal(ks[14], (B, 6), jnp.float32) * 0.1
    transl = jax.random.normal(ks[15], (B, 3), jnp.float32) * 0.05

    # One-time (model-init) preparation.  tile=128 at V=300 pads V->384 and
    # gives a 3-step grid, exercising both padding and multi-tile pipelining.
    # Production: prepare_flame(params) (tile=2048 f32, or bf16 dirs + 4096).
    prep = prepare_flame(params, tile=128, dirs_dtype=jnp.float32)

    verts, lmks = flame_forward(prep, shape_params, expression_params,
                                pose_params, eye_pose, jaw_pose, neck_pose,
                                transl)
    jax.block_until_ready((verts, lmks))

    ref_verts, ref_lmks = flame_reference(params, shape_params,
                                          expression_params, pose_params,
                                          eye_pose, jaw_pose, neck_pose, transl)
    assert verts.shape == (B, V, 3) and lmks.shape == (B, L, 3)
    assert jnp.allclose(verts, ref_verts, atol=1e-4, rtol=1e-4)
    assert jnp.allclose(lmks, ref_lmks, atol=1e-4, rtol=1e-4)
    print("KERNEL_OK")
</pallas_src>

<mosaic_0001>
module attributes {stable_mosaic.version = 11 : i64} {
  func.func @_fused_blend_skin_kernel(%arg0: i32, %arg1: memref<2x24xf32, #tpu.memory_space<vmem>>, %arg2: memref<2x36xf32, #tpu.memory_space<vmem>>, %arg3: memref<2x12x8xf32, #tpu.memory_space<vmem>>, %arg4: memref<2x3x1xf32, #tpu.memory_space<vmem>>, %arg5: memref<3x128xf32, #tpu.memory_space<vmem>>, %arg6: memref<3x24x128xf32, #tpu.memory_space<vmem>>, %arg7: memref<3x36x128xf32, #tpu.memory_space<vmem>>, %arg8: memref<8x128xf32, #tpu.memory_space<vmem>>, %arg9: memref<2x3x128xf32, #tpu.memory_space<vmem>>) attributes {dimension_semantics = [#tpu.dimension_semantics<parallel>], iteration_bounds = array<i64: 3>, scalar_prefetch = 0 : i64, scratch_operands = 0 : i64, tpu.core_type = #tpu.core_type<tc>, window_params = [{pipeline_mode = #tpu.pipeline_mode<synchronous>, transform_indices = @transform_0, window_bounds = array<i64: 2, 24>}, {pipeline_mode = #tpu.pipeline_mode<synchronous>, transform_indices = @transform_1, window_bounds = array<i64: 2, 36>}, {pipeline_mode = #tpu.pipeline_mode<synchronous>, transform_indices = @transform_2, window_bounds = array<i64: 2, 12, 8>}, {pipeline_mode = #tpu.pipeline_mode<synchronous>, transform_indices = @transform_3, window_bounds = array<i64: 2, 3, 1>}, {transform_indices = @transform_4, window_bounds = array<i64: 3, 128>}, {transform_indices = @transform_5, window_bounds = array<i64: 3, 24, 128>}, {transform_indices = @transform_6, window_bounds = array<i64: 3, 36, 128>}, {transform_indices = @transform_7, window_bounds = array<i64: 8, 128>}, {transform_indices = @transform_8, window_bounds = array<i64: 2, 3, 128>}]} {
    %c0 = arith.constant 0 : index
    %c0_0 = arith.constant 0 : index
    %0 = vector.load %arg1[%c0, %c0_0] : memref<2x24xf32, #tpu.memory_space<vmem>>, vector<2x24xf32>
    %c0_1 = arith.constant 0 : index
    %c0_2 = arith.constant 0 : index
    %1 = vector.load %arg2[%c0_1, %c0_2] : memref<2x36xf32, #tpu.memory_space<vmem>>, vector<2x36xf32>
    %c0_3 = arith.constant 0 : index
    %c0_4 = arith.constant 0 : index
    %2 = vector.load %arg8[%c0_3, %c0_4] : memref<8x128xf32, #tpu.memory_space<vmem>>, vector<8x128xf32>
    %c0_5 = arith.constant 0 : index
    %c0_6 = arith.constant 0 : index
    %3 = vector.load %arg5[%c0_5, %c0_6] : memref<3x128xf32, #tpu.memory_space<vmem>>, vector<3x128xf32>
    %c0_7 = arith.constant 0 : index
    %c0_8 = arith.constant 0 : index
    %c0_9 = arith.constant 0 : index
    %4 = vector.load %arg3[%c0_7, %c0_8, %c0_9] : memref<2x12x8xf32, #tpu.memory_space<vmem>>, vector<2x12x8xf32>
    %5 = vector.extract_strided_slice %3 {offsets = [0, 0], sizes = [1, 128], strides = [1, 1]} : vector<3x128xf32> to vector<1x128xf32>
    %c0_10 = arith.constant 0 : index
    %c0_11 = arith.constant 0 : index
    %c0_12 = arith.constant 0 : index
    %6 = vector.load %arg6[%c0_10, %c0_11, %c0_12] : memref<3x24x128xf32, #tpu.memory_space<vmem>>, vector<1x24x128xf32>
    %7 = vector.shape_cast %6 : vector<1x24x128xf32> to vector<24x128xf32>
    %cst = arith.constant dense<0.000000e+00> : vector<2x128xf32>
    %8 = tpu.matmul %0, %7, %cst {dimension_numbers = #tpu.dot_dimension_numbers<[1], [0], [0], [1], [0, 0, 1, 1], [], []>} : vector<2x24xf32>, vector<24x128xf32>, vector<2x128xf32> -> vector<2x128xf32>
    %9 = vector.broadcast %5 : vector<1x128xf32> to vector<2x128xf32>
    %10 = arith.addf %9, %8 : vector<2x128xf32>
    %c0_13 = arith.constant 0 : index
    %c0_14 = arith.constant 0 : index
    %c0_15 = arith.constant 0 : index
    %11 = vector.load %arg7[%c0_13, %c0_14, %c0_15] : memref<3x36x128xf32, #tpu.memory_space<vmem>>, vector<1x36x128xf32>
    %12 = vector.shape_cast %11 : vector<1x36x128xf32> to vector<36x128xf32>
    %cst_16 = arith.constant dense<0.000000e+00> : vector<2x128xf32>
    %13 = tpu.matmul %1, %12, %cst_16 {dimension_numbers = #tpu.dot_dimension_numbers<[1], [0], [0], [1], [0, 0, 1, 1], [], []>} : vector<2x36xf32>, vector<36x128xf32>, vector<2x128xf32> -> vector<2x128xf32>
    %14 = arith.addf %10, %13 : vector<2x128xf32>
    %15 = vector.extract_strided_slice %3 {offsets = [1, 0], sizes = [1, 128], strides = [1, 1]} : vector<3x128xf32> to vector<1x128xf32>
    %c1 = arith.constant 1 : index
    %c0_17 = arith.constant 0 : index
    %c0_18 = arith.constant 0 : index
    %16 = vector.load %arg6[%c1, %c0_17, %c0_18] : memref<3x24x128xf32, #tpu.memory_space<vmem>>, vector<1x24x128xf32>
    %17 = vector.shape_cast %16 : vector<1x24x128xf32> to vector<24x128xf32>
    %cst_19 = arith.constant dense<0.000000e+00> : vector<2x128xf32>
    %18 = tpu.matmul %0, %17, %cst_19 {dimension_numbers = #tpu.dot_dimension_numbers<[1], [0], [0], [1], [0, 0, 1, 1], [], []>} : vector<2x24xf32>, vector<24x128xf32>, vector<2x128xf32> -> vector<2x128xf32>
    %19 = vector.broadcast %15 : vector<1x128xf32> to vector<2x128xf32>
    %20 = arith.addf %19, %18 : vector<2x128xf32>
    %c1_20 = arith.constant 1 : index
    %c0_21 = arith.constant 0 : index
    %c0_22 = arith.constant 0 : index
    %21 = vector.load %arg7[%c1_20, %c0_21, %c0_22] : memref<3x36x128xf32, #tpu.memory_space<vmem>>, vector<1x36x128xf32>
    %22 = vector.shape_cast %21 : vector<1x36x128xf32> to vector<36x128xf32>
    %cst_23 = arith.constant dense<0.000000e+00> : vector<2x128xf32>
    %23 = tpu.matmul %1, %22, %cst_23 {dimension_numbers = #tpu.dot_dimension_numbers<[1], [0], [0], [1], [0, 0, 1, 1], [], []>} : vector<2x36xf32>, vector<36x128xf32>, vector<2x128xf32> -> vector<2x128xf32>
    %24 = arith.addf %20, %23 : vector<2x128xf32>
    %25 = vector.extract_strided_slice %3 {offsets = [2, 0], sizes = [1, 128], strides = [1, 1]} : vector<3x128xf32> to vector<1x128xf32>
    %c2 = arith.constant 2 : index
    %c0_24 = arith.constant 0 : index
    %c0_25 = arith.constant 0 : index
    %26 = vector.load %arg6[%c2, %c0_24, %c0_25] : memref<3x24x128xf32, #tpu.memory_space<vmem>>, vector<1x24x128xf32>
    %27 = vector.shape_cast %26 : vector<1x24x128xf32> to vector<24x128xf32>
    %cst_26 = arith.constant dense<0.000000e+00> : vector<2x128xf32>
    %28 = tpu.matmul %0, %27, %cst_26 {dimension_numbers = #tpu.dot_dimension_numbers<[1], [0], [0], [1], [0, 0, 1, 1], [], []>} : vector<2x24xf32>, vector<24x128xf32>, vector<2x128xf32> -> vector<2x128xf32>
    %29 = vector.broadcast %25 : vector<1x128xf32> to vector<2x128xf32>
    %30 = arith.addf %29, %28 : vector<2x128xf32>
    %c2_27 = arith.constant 2 : index
    %c0_28 = arith.constant 0 : index
    %c0_29 = arith.constant 0 : index
    %31 = vector.load %arg7[%c2_27, %c0_28, %c0_29] : memref<3x36x128xf32, #tpu.memory_space<vmem>>, vector<1x36x128xf32>
    %32 = vector.shape_cast %31 : vector<1x36x128xf32> to vector<36x128xf32>
    %cst_30 = arith.constant dense<0.000000e+00> : vector<2x128xf32>
    %33 = tpu.matmul %1, %32, %cst_30 {dimension_numbers = #tpu.dot_dimension_numbers<[1], [0], [0], [1], [0, 0, 1, 1], [], []>} : vector<2x36xf32>, vector<36x128xf32>, vector<2x128xf32> -> vector<2x128xf32>
    %34 = arith.addf %30, %33 : vector<2x128xf32>
    %35 = vector.extract_strided_slice %4 {offsets = [0, 0, 0], sizes = [1, 12, 8], strides = [1, 1, 1]} : vector<2x12x8xf32> to vector<1x12x8xf32>
    %36 = vector.shape_cast %35 : vector<1x12x8xf32> to vector<12x8xf32>
    %cst_31 = arith.constant dense<0.000000e+00> : vector<12x128xf32>
    %37 = tpu.matmul %36, %2, %cst_31 {dimension_numbers = #tpu.dot_dimension_numbers<[1], [0], [0], [1], [0, 0, 1, 1], [], []>} : vector<12x8xf32>, vector<8x128xf32>, vector<12x128xf32> -> vector<12x128xf32>
    %38 = vector.extract_strided_slice %37 {offsets = [0, 0], sizes = [3, 128], strides = [1, 1]} : vector<12x128xf32> to vector<3x128xf32>
    %39 = vector.extract_strided_slice %14 {offsets = [0, 0], sizes = [1, 128], strides = [1, 1]} : vector<2x128xf32> to vector<1x128xf32>
    %40 = vector.broadcast %39 : vector<1x128xf32> to vector<3x128xf32>
    %41 = arith.mulf %38, %40 : vector<3x128xf32>
    %42 = vector.extract_strided_slice %37 {offsets = [3, 0], sizes = [3, 128], strides = [1, 1]} : vector<12x128xf32> to vector<3x128xf32>
    %43 = vector.extract_strided_slice %24 {offsets = [0, 0], sizes = [1, 128], strides = [1, 1]} : vector<2x128xf32> to vector<1x128xf32>
    %44 = vector.broadcast %43 : vector<1x128xf32> to vector<3x128xf32>
    %45 = arith.mulf %42, %44 : vector<3x128xf32>
    %46 = arith.addf %41, %45 : vector<3x128xf32>
    %47 = vector.extract_strided_slice %37 {offsets = [6, 0], sizes = [3, 128], strides = [1, 1]} : vector<12x128xf32> to vector<3x128xf32>
    %48 = vector.extract_strided_slice %34 {offsets = [0, 0], sizes = [1, 128], strides = [1, 1]} : vector<2x128xf32> to vector<1x128xf32>
    %49 = vector.broadcast %48 : vector<1x128xf32> to vector<3x128xf32>
    %50 = arith.mulf %47, %49 : vector<3x128xf32>
    %51 = arith.addf %46, %50 : vector<3x128xf32>
    %52 = vector.extract_strided_slice %37 {offsets = [9, 0], sizes = [3, 128], strides = [1, 1]} : vector<12x128xf32> to vector<3x128xf32>
    %53 = arith.addf %51, %52 : vector<3x128xf32>
    %c0_32 = arith.constant 0 : index
    %c0_33 = arith.constant 0 : index
    %c0_34 = arith.constant 0 : index
    %54 = vector.load %arg4[%c0_32, %c0_33, %c0_34] : memref<2x3x1xf32, #tpu.memory_space<vmem>>, vector<1x3x1xf32>
    %55 = vector.shape_cast %54 : vector<1x3x1xf32> to vector<3x1xf32>
    %56 = vector.broadcast %55 : vector<3x1xf32> to vector<3x128xf32>
    %57 = arith.addf %53, %56 : vector<3x128xf32>
    %c0_35 = arith.constant 0 : index
    %c0_36 = arith.constant 0 : index
    %c0_37 = arith.constant 0 : index
    %58 = vector.load %arg9[%c0_35, %c0_36, %c0_37] : memref<2x3x128xf32, #tpu.memory_space<vmem>>, vector<1x3x128xf32>
    %59 = vector.shape_cast %58 : vector<1x3x128xf32> to vector<3x128xf32>
    %60 = vector.shape_cast %57 : vector<3x128xf32> to vector<1x3x128xf32>
    tpu.vector_store %arg9[%c0_35, %c0_36, %c0_37], %60 {strides = array<i32>} : memref<2x3x128xf32, #tpu.memory_space<vmem>>, vector<1x3x128xf32>,
    %61 = vector.extract_strided_slice %4 {offsets = [1, 0, 0], sizes = [1, 12, 8], strides = [1, 1, 1]} : vector<2x12x8xf32> to vector<1x12x8xf32>
    %62 = vector.shape_cast %61 : vector<1x12x8xf32> to vector<12x8xf32>
    %cst_38 = arith.constant dense<0.000000e+00> : vector<12x128xf32>
    %63 = tpu.matmul %62, %2, %cst_38 {dimension_numbers = #tpu.dot_dimension_numbers<[1], [0], [0], [1], [0, 0, 1, 1], [], []>} : vector<12x8xf32>, vector<8x128xf32>, vector<12x128xf32> -> vector<12x128xf32>
    %64 = vector.extract_strided_slice %63 {offsets = [0, 0], sizes = [3, 128], strides = [1, 1]} : vector<12x128xf32> to vector<3x128xf32>
    %65 = vector.extract_strided_slice %14 {offsets = [1, 0], sizes = [1, 128], strides = [1, 1]} : vector<2x128xf32> to vector<1x128xf32>
    %66 = vector.broadcast %65 : vector<1x128xf32> to vector<3x128xf32>
    %67 = arith.mulf %64, %66 : vector<3x128xf32>
    %68 = vector.extract_strided_slice %63 {offsets = [3, 0], sizes = [3, 128], strides = [1, 1]} : vector<12x128xf32> to vector<3x128xf32>
    %69 = vector.extract_strided_slice %24 {offsets = [1, 0], sizes = [1, 128], strides = [1, 1]} : vector<2x128xf32> to vector<1x128xf32>
    %70 = vector.broadcast %69 : vector<1x128xf32> to vector<3x128xf32>
    %71 = arith.mulf %68, %70 : vector<3x128xf32>
    %72 = arith.addf %67, %71 : vector<3x128xf32>
    %73 = vector.extract_strided_slice %63 {offsets = [6, 0], sizes = [3, 128], strides = [1, 1]} : vector<12x128xf32> to vector<3x128xf32>
    %74 = vector.extract_strided_slice %34 {offsets = [1, 0], sizes = [1, 128], strides = [1, 1]} : vector<2x128xf32> to vector<1x128xf32>
    %75 = vector.broadcast %74 : vector<1x128xf32> to vector<3x128xf32>
    %76 = arith.mulf %73, %75 : vector<3x128xf32>
    %77 = arith.addf %72, %76 : vector<3x128xf32>
    %78 = vector.extract_strided_slice %63 {offsets = [9, 0], sizes = [3, 128], strides = [1, 1]} : vector<12x128xf32> to vector<3x128xf32>
    %79 = arith.addf %77, %78 : vector<3x128xf32>
    %c1_39 = arith.constant 1 : index
    %c0_40 = arith.constant 0 : index
    %c0_41 = arith.constant 0 : index
    %80 = vector.load %arg4[%c1_39, %c0_40, %c0_41] : memref<2x3x1xf32, #tpu.memory_space<vmem>>, vector<1x3x1xf32>
    %81 = vector.shape_cast %80 : vector<1x3x1xf32> to vector<3x1xf32>
    %82 = vector.broadcast %81 : vector<3x1xf32> to vector<3x128xf32>
    %83 = arith.addf %79, %82 : vector<3x128xf32>
    %c1_42 = arith.constant 1 : index
    %c0_43 = arith.constant 0 : index
    %c0_44 = arith.constant 0 : index
    %84 = vector.load %arg9[%c1_42, %c0_43, %c0_44] : memref<2x3x128xf32, #tpu.memory_space<vmem>>, vector<1x3x128xf32>
    %85 = vector.shape_cast %84 : vector<1x3x128xf32> to vector<3x128xf32>
    %86 = vector.shape_cast %83 : vector<3x128xf32> to vector<1x3x128xf32>
    tpu.vector_store %arg9[%c1_42, %c0_43, %c0_44], %86 {strides = array<i32>} : memref<2x3x128xf32, #tpu.memory_space<vmem>>, vector<1x3x128xf32>,
    return
  }
  func.func @transform_0(%arg0: i32) -> (i32, i32) {
    %c0_i32 = arith.constant 0 : i32
    %c0_i32_0 = arith.constant 0 : i32
    %c0_i32_1 = arith.constant 0 : i32
    return %c0_i32, %c0_i32_0 : i32, i32
  }
  func.func @transform_1(%arg0: i32) -> (i32, i32) {
    %c0_i32 = arith.constant 0 : i32
    %c0_i32_0 = arith.constant 0 : i32
    %c0_i32_1 = arith.constant 0 : i32
    return %c0_i32, %c0_i32_0 : i32, i32
  }
  func.func @transform_2(%arg0: i32) -> (i32, i32, i32) {
    %c0_i32 = arith.constant 0 : i32
    %c0_i32_0 = arith.constant 0 : i32
    %c0_i32_1 = arith.constant 0 : i32
    %c0_i32_2 = arith.constant 0 : i32
    return %c0_i32, %c0_i32_0, %c0_i32_1 : i32, i32, i32
  }
  func.func @transform_3(%arg0: i32) -> (i32, i32, i32) {
    %c0_i32 = arith.constant 0 : i32
    %c0_i32_0 = arith.constant 0 : i32
    %c0_i32_1 = arith.constant 0 : i32
    %c0_i32_2 = arith.constant 0 : i32
    return %c0_i32, %c0_i32_0, %c0_i32_1 : i32, i32, i32
  }
  func.func @transform_4(%arg0: i32) -> (i32, i32) {
    %c0_i32 = arith.constant 0 : i32
    %c0_i32_0 = arith.constant 0 : i32
    return %c0_i32, %arg0 : i32, i32
  }
  func.func @transform_5(%arg0: i32) -> (i32, i32, i32) {
    %c0_i32 = arith.constant 0 : i32
    %c0_i32_0 = arith.constant 0 : i32
    %c0_i32_1 = arith.constant 0 : i32
    return %c0_i32, %c0_i32_0, %arg0 : i32, i32, i32
  }
  func.func @transform_6(%arg0: i32) -> (i32, i32, i32) {
    %c0_i32 = arith.constant 0 : i32
    %c0_i32_0 = arith.constant 0 : i32
    %c0_i32_1 = arith.constant 0 : i32
    return %c0_i32, %c0_i32_0, %arg0 : i32, i32, i32
  }
  func.func @transform_7(%arg0: i32) -> (i32, i32) {
    %c0_i32 = arith.constant 0 : i32
    %c0_i32_0 = arith.constant 0 : i32
    return %c0_i32, %arg0 : i32, i32
  }
  func.func @transform_8(%arg0: i32) -> (i32, i32, i32) {
    %c0_i32 = arith.constant 0 : i32
    %c0_i32_0 = arith.constant 0 : i32
    %c0_i32_1 = arith.constant 0 : i32
    return %c0_i32, %c0_i32_0, %arg0 : i32, i32, i32
  }
}

</mosaic_0001>

<bundles_post_ra>
// kernel: tpu_custom_call.1
= control target key start
LH: loop header
LB: loop body
LE: loop exit
PB: predicated region body
PF: predicated region fallthrough
CT: control target
= control target key end

     0   :  { %s1974_s0 = inlined_call_operand.vmem [shape: f32[2,24], index: 0, kind: input, shape index: {}]   ;;  %s1975_s1 = inlined_call_operand.vmem [shape: f32[2,36], index: 1, kind: input, shape index: {}]   ;;  %s1976_s2 = inlined_call_operand.vmem [shape: f32[2,12,8], index: 2, kind: input, shape index: {}]   ;;  %s1977_s3 = inlined_call_operand.vmem [shape: f32[2,3,1], index: 3, kind: input, shape index: {}]   ;;  %s1978_s4 = inlined_call_operand.vmem [shape: f32[3,384], index: 4, kind: input, shape index: {}]   ;;  %s1979_s5 = inlined_call_operand.hbm [shape: f32[3,24,384], index: 5, kind: input, shape index: {}]   ;;  %s1980_s6 = inlined_call_operand.hbm [shape: f32[3,36,384], index: 6, kind: input, shape index: {}]   ;;  %s1981_s7 = inlined_call_operand.vmem [shape: f32[8,384], index: 7, kind: input, shape index: {}]   ;;  %s1982_s8 = inlined_call_operand.vmem [shape: f32[2,3,384], index: 8, kind: output, shape index: {}]  }
   0x1   :  { %1984 = sst [smem:[#allocation10_spill]] %s1979_s5 }
   0x2   :  { %13 = vsyncpa [#allocation3], 0 }
   0x3   :  { %15 = vsyncpa [#allocation3 + $0x1], 0 }
   0x4   :  { %16 = vsyncpa [#allocation5], 0 }
   0x5   :  { %18 = vsyncpa [#allocation5 + $0x1], 0  ;;  %s1690_s27 = smov 0   ;;  %s1692_s28 = smov 0  }
   0x6   :  { %s1694_s29 = smov 0   ;;  %s1696_s30 = smov 0  }
   0x7 LB: > { %s1709_s9 = sadd.s32 4294967295, %s1634_s30   ;;  %s1712_s10 = sadd.s32 1, %s1634_s30   ;;  %s1634_s30 = sphi %s1696_s30, %s1997_s30   ;;  %s1630_s29 = sphi %s1694_s29, %s1996_s29   ;;  %s1626_s28 = sphi %s1692_s28, %s1995_s28   ;;  %s1622_s27 = sphi %s1690_s27, %s1994_s27  }
   0x8   : > { %s138_s11 = ssub.s32 %s1634_s30, %s1712_s10  ;;  %s141_s12 = sadd.s32 1, %s1630_s29 }
   0x9   : > { %p139_p0 = scmp.eq.s32.totalorder %s138_s11, 0  ;;  %p148_p1 = scmp.ne.s32.totalorder %s1630_s29, %s1626_s28 }
   0xa   : > { %p149_p2 = scmp.eq.s32.totalorder %s1634_s30, 0  ;;  %p154_p3 = scmp.ne.s32.totalorder %s1626_s28, %s1622_s27 }
   0xb   : > { %s1722_s13 = scalar_select %p139_p0, %s1630_s29, %s141_s12  }
   0xc   : > { %p150_p4 = por %p149_p2, %p148_p1  ;;  %p155_p5 = scmp.eq.s32.totalorder %s1709_s9, 0 }
   0xd   : > { %1985 = sst [smem:[#allocation9_spill]] %s1722_s13  ;;  %p230_p6 = scmp.eq.s32.totalorder %s1709_s9, 2 }
   0xe   : > { %p1726_p7 = por %p155_p5, %p154_p3  ;;  %p1495_p8 = scmp.lt.s32.totalorder %s1634_s30, 3 }
   0xf   : > { %p1731_p9 = por %p230_p6, %p148_p1  ;;  %s1736_s16 = sand.u32 1, %s1630_s29  }
  0x10   : > { %s1986_s14 = scalar_select %p1726_p7, 1, 0 }
  0x11   : > { %s1987_s15 = scalar_select %p1731_p9, 1, 0 }
  0x12   : > { %s1480_s17 = smul.u32 72, %s1736_s16  ;;  %s1292_s18 = sshll.u32 %s1634_s30, 7 }
  0x13   : > { %p1740_p10 = pnand %p1495_p8, %p150_p4  ;;  %s1989_s5 = sld [smem:[#allocation10_spill]] }
  0x14   : > { %s279_s23 = scalar_lea.vmem [#allocation2], %s1480_s17  ;;  %s276_s25 = scalar_lea.sflag [#allocation3], %s1736_s16 }
  0x15   : > { %s285_s24 = sshll.u32 %s279_s23, 4  ;;  %p1538_p12 = pneg %p1740_p10  ;;  %s1751_s24 = int_to_ptr.vmem [resolvable:$true] %s285_s24 }
  0x19   : > { %s1749_s22 = scalar_lea.hbm %s1989_s5, %s1292_s18  ;;  %s1541_s12 = scalar_lea.hbm %s1989_s5, 3456 }
  0x1a   : > { %s1536_s26 = scalar_lea.hbm %s1749_s22, 1152  ;;  %p1542_p1 = scmp.lt.u32.totalorder %s1749_s22, %s1989_s5 }
  0x1b   : > { %p1537_p11 = scmp.ne.s32.totalorder %s1749_s22, %s1536_s26  ;;  %p1543_p2 = scmp.lt.u32.totalorder %s1541_s12, %s1536_s26 }
  0x1c   : > { %p1545_p4 = scmp.lt.u32.totalorder %s1536_s26, %s1749_s22 }
  0x1d   : > { %p1539_p13 = pnand %p1538_p12, %p1537_p11  ;;  %p1544_p3 = por %p1543_p2, %p1542_p1 }
  0x1f   : > { %p1540_p0 = pneg %p1539_p13  ;;  %p1546_p5 = por %p1545_p4, %p1544_p3 }
  0x21   : > { %p1547_p6 = pnand %p1546_p5, %p1540_p0 }
  0x23   : > { %1550 = shalt.err (!%p1547_p6)
}
  0x24   : > { %s1551_s17 = scalar_lea.vmem %s1751_s24, 1152  ;;  %s1636_s23 = smov [#allocation2]  }
  0x25   : > { %p1552_p8 = scmp.ne.s32.totalorder %s1751_s24, %s1551_s17  ;;  %s1556_s27 = sshll.u32 %s1636_s23, 4  ;;  %s1557_s27 = int_to_ptr.vmem [resolvable:$false] %s1556_s27 }
  0x26   : > { %s1558_s11 = scalar_lea.vmem %s1557_s27, 2304  ;;  %p1559_p9 = scmp.lt.s32.totalorder %s1751_s24, %s1557_s27 }
  0x27   : > { %p1554_p11 = pnand %p1552_p8, %p1538_p12  ;;  %p1560_p1 = scmp.lt.s32.totalorder %s1558_s11, %s1551_s17 }
  0x29   : > { %p1555_p13 = pneg %p1554_p11  ;;  %p1561_p2 = por %p1560_p1, %p1559_p9 }
  0x2b   : > { %p1562_p3 = pnand %p1561_p2, %p1555_p13 }
  0x2d   : > { %1565 = shalt.err (!%p1562_p3)
}
  0x2e   : > { %s1637_s26 = smov 384   ;;  %s1638_s12 = smov 128  }
  0x2f   : > { %s1639_s20 = smov 8   ;;  %p1294_p9 = scmp.ge.s32.totalorder %s1634_s30, 1 }
  0x30   : > { %1491 = dma.hbm_to_vmem [thread:$0]  (!%p1740_p10), %s1749_s22, 1152, %s1751_s24, %s276_s25, %s1637_s26, %s1638_s12, %s1639_s20  }
  0x31   : > { %p320_p0 = scmp.lt.s32.totalorder %s1634_s30, 4  ;;  %s1481_s21 = smul.u32 120, %s1736_s16 }
  0x32   : > { %s1796_s11 = scalar_lea.hbm %s1980_s6, %s1292_s18  ;;  %s296_s22 = scalar_lea.sflag [#allocation5], %s1736_s16 }
  0x33   : > { %p1787_p4 = pnand %p1294_p9, %p320_p0  ;;  %s299_s5 = scalar_lea.vmem [#allocation4], %s1481_s21 }
  0x34   : > { %s305_s13 = sshll.u32 %s299_s5, 4  ;;  %s1566_s24 = scalar_lea.hbm %s1796_s11, 1920  ;;  %s1798_s13 = int_to_ptr.vmem [resolvable:$true] %s305_s13 }
  0x35   : > { %p1567_p5 = scmp.ne.s32.totalorder %s1796_s11, %s1566_s24  ;;  %s1571_s18 = scalar_lea.hbm %s1980_s6, 5760 }
  0x36   : > { %p1572_p11 = scmp.lt.u32.totalorder %s1796_s11, %s1980_s6  ;;  %p1573_p13 = scmp.lt.u32.totalorder %s1571_s18, %s1566_s24 }
  0x37   : > { %p1569_p6 = pnand %p1567_p5, %p1538_p12  ;;  %p1575_p2 = scmp.lt.u32.totalorder %s1566_s24, %s1796_s11 }
  0x38   : > { %p1574_p1 = por %p1573_p13, %p1572_p11 }
  0x39   : > { %p1570_p8 = pneg %p1569_p6 }
  0x3a   : > { %p1576_p3 = por %p1575_p2, %p1574_p1 }
  0x3c   : > { %p1577_p9 = pnand %p1576_p3, %p1570_p8 }
  0x3e   : > { %1580 = shalt.err (!%p1577_p9)
}
  0x3f   : > { %s1581_s5 = scalar_lea.vmem %s1798_s13, 1920  ;;  %s1640_s21 = smov [#allocation4]  }
  0x40   : > { %p1582_p0 = scmp.ne.s32.totalorder %s1798_s13, %s1581_s5  ;;  %s1586_s30 = sshll.u32 %s1640_s21, 4  ;;  %s1587_s30 = int_to_ptr.vmem [resolvable:$false] %s1586_s30 }
  0x41   : > { %s1588_s25 = scalar_lea.vmem %s1587_s30, 3840  ;;  %p1589_p7 = scmp.lt.s32.totalorder %s1798_s13, %s1587_s30 }
  0x42   : > { %p1584_p5 = pnand %p1582_p0, %p1538_p12  ;;  %p1590_p11 = scmp.lt.s32.totalorder %s1588_s25, %s1581_s5 }
  0x44   : > { %p1585_p6 = pneg %p1584_p5  ;;  %p1591_p13 = por %p1590_p11, %p1589_p7 }
  0x46   : > { %p1592_p1 = pnand %p1591_p13, %p1585_p6 }
  0x48   : > { %1595 = shalt.err (!%p1592_p1)
}
  0x49   : > { %1494 = dma.hbm_to_vmem [thread:$0]  (!%p1740_p10), %s1796_s11, 1920, %s1798_s13, %s296_s22, %s1637_s26, %s1638_s12, %s1639_s20  }
  0x4a   : > { %324 = sbr.rel (%p1787_p4) target bundleno = 354 (0x162), region = 52  ;;  %s1832_s24 = sand.u32 (!%p1787_p4), 1, %s1626_s28  }
  0x4b   : > { %s1482_s18 = smul.u32 (!%p1787_p4), 72, %s1832_s24  ;;  %s327_s23 = scalar_lea.sflag (!%p1787_p4), [#allocation3], %s1832_s24 }
  0x4c   : > { %p1991_p7 = scmp.ne.s32.totalorder (!%p1787_p4), %s1986_s14, 0 }
  0x4d   : > { %s1836_s19 = scalar_lea.vmem (!%p1787_p4), [#allocation2], %s1482_s18 }
  0x51   : > { %1613 = dma.done.wait (%p1991_p7), %s327_s23, 1152  }
  0x52   : > { %1615 = vsyncadd (%p1991_p7), %s327_s23, 4294966144  ;;  %s1483_s13 = smul.u32 120, %s1832_s24  ;;  %s336_s16 = scalar_lea.sflag [#allocation5], %s1832_s24 }
  0x54   : > { %s1844_s26 = scalar_lea.vmem [#allocation4], %s1483_s13 }
  0x55   : > { %1617 = dma.done.wait (%p1991_p7), %s336_s16, 1920  }
  0x56   : > { %1619 = vsyncadd (%p1991_p7), %s336_s16, 4294965376  ;;  %v1641_v0 = vmov 0.0|0.0   ;;  %vm1642_vm0 = vmmov 0   ;;  %v1643_v1 = vmov 0.0   ;;  %v1644_v2 = vmov 0   ;;  %v400_v3 = vld [vmem:[%s1836_s19] sm:$0xff] }
  0x57   : > { %1445 = vmatprep.subr.bf16.mxu1 %v1641_v0  ;;  %1448 = vmatprep.subr.bf16.mxu0 %v1641_v0  ;;  %v401_v4 = vld [vmem:[%s1836_s19 + $0x8] sm:$0xff]  ;;  %v482_v5 = vld [vmem:[%s1844_s26] sm:$0xff]  ;;  %v484_v8 = vld [vmem:[%s1844_s26 + $0x10] sm:$0xff]  ;;  %vm403_vm1 = vcmask 195584   ;;  %p384_p10 = scmp.lt.s32.totalorder %s1709_s9, 2  ;;  %vm491_vm2 = vcmask 1043456   ;;  %v477_v45 = vlaneseq }
  0x58   : > { %1375 = vmatprep.mubr.msk.f32.mxu1 %vm1642_vm0, %v1643_v1  ;;  %1388 = vmatprep.mubr.msk.f32.mxu0 %vm1642_vm0, %v1643_v1  ;;  %v1446_v6 = vpack.c.bf16 %v401_v4, %v400_v3  ;;  %v483_v7 = vld [vmem:[%s1844_s26 + $0x8] sm:$0xff]  ;;  %v485_v10 = vld [vmem:[%s1844_s26 + $0x18] sm:$0xff]  ;;  %v1302_v12 = vld [vmem:[%s1836_s19 + $0x20] sm:$0xff]  ;;  %vm487_vm3 = vcmask 293888   ;;  %vm884_vm4 = vcmask 64512   ;;  %vm988_vm5 = vcmask 1041408  }
  0x59   : > { %1535 = vset.pattern.permute.xlu0 %v1644_v2  ;;  %v1449_v9 = vpack.c.bf16 %v483_v7, %v482_v5  ;;  %v1301_v11 = vld [vmem:[%s1836_s19 + $0x18] sm:$0xff]  ;;  %v402_v13 = vld [vmem:[%s1836_s19 + $0x10] sm:$0xff]  ;;  %v1452_v14 = vpack.c.bf16 %v485_v10, %v484_v8  ;;  %v1303_v25 = vld [vmem:[%s1836_s19 + $0x28] sm:$0xff]  ;;  %s1894_s27 = scalar_select %p384_p10, %s1709_s9, 2  ;;  %v478_v46 = vshrl.u32 %v477_v45, 7 }
  0x5a   : > { %1447 = vmatpush3.bf16.msra.mxu1 %v1446_v6  ;;  %v392_v15 = vld [vmem:[%s1974_s0] sm:$0x3]  ;;  %v1455_v16 = vpack.c.bf16 %v1302_v12, %v1301_v11  ;;  %v1312_v17 = vld [vmem:[%s1836_s19 + $0x30] sm:$0xff]  ;;  %v1305_v20 = vld [vmem:[%s1844_s26 + $0x28] sm:$0xff]  ;;  %p1992_p12 = scmp.ne.s32.totalorder %s1987_s15, 0 }
  0x5b   : > { %1450 = vmatpush3.bf16.msra.mxu0 %v1449_v9  ;;  %1373 = vmatprep.subr.mxu1 %v1643_v1  ;;  %v1313_v18 = vld [vmem:[%s1836_s19 + $0x38] sm:$0xff]  ;;  %v486_v19 = vld [vmem:[%s1844_s26 + $0x20] sm:$0xf]  ;;  %v1306_v21 = vld [vmem:[%s1844_s26 + $0x30] sm:$0xff]  ;;  %s1297_s5 = sshll.u32 %s1894_s27, 3  ;;  %s1296_s11 = sshll.u32 %s1894_s27, 2 }
  0x5c   : > { %1451 = vmatprep.subr.bf16.mxu0 %v1641_v0  ;;  %v393_v22 = vld [vmem:[%s1975_s1] sm:$0x3]  ;;  %v1464_v23 = vpack.c.bf16 %v1313_v18, %v1312_v17  ;;  %v1458_v26 = vpack.c.bf16 %v1306_v21, %v1305_v20  ;;  %v1308_v28 = vld [vmem:[%s1844_s26 + $0x40] sm:$0xff]  ;;  %v1319_v35 = vld [vmem:[%s1844_s26 + $0x68] sm:$0xff]  ;;  %s391_s25 = scalar_lea.vmem %s1981_s7, %s1297_s5  ;;  %s387_s21 = scalar_lea.vmem %s1978_s4, %s1296_s11  ;;  %v479_v47 = vsub.s32 0, %v478_v46  ;;  %v642_v56 = vsub.s32 1, %v478_v46 }
  0x5d   : > { %v998_v24 = vld [vmem:[%s1977_s3] sm:$0x7]  ;;  %v1318_v34 = vld [vmem:[%s1844_s26 + $0x60] sm:$0xff]  ;;  %v1327_v36 = vld [vmem:[%s1977_s3 + $0x4] sm:$0x7]  ;;  %v801_v58 = vsub.s32 2, %v478_v46 }
  0x5e   : > { %1374 = vmatpush3.msra.mxu1 %v402_v13  ;;  %1001 = vperm.xlu0 %1535, %v998_v24   ;;  %v1307_v27 = vld [vmem:[%s1844_s26 + $0x38] sm:$0xff]  ;;  %v1316_v29 = vld [vmem:[%s1844_s26 + $0x50] sm:$0xff]  ;;  %v1470_v37 = vpack.c.bf16 %v1319_v35, %v1318_v34  ;;  %v1309_v38 = vld [vmem:[%s1844_s26 + $0x48] sm:$0xf]  ;;  %s1295_s27 = sshll.u32 %s1832_s24, 3 }
  0x5f   : > { %1453 = vmatpush3.bf16.msra.mxu0 %v1452_v14  ;;  %1376 = vmatmul.mubr.msk.f32.vlgmr.msra.gmra.mrb[0].mxu1 %vm403_vm1, %v392_v15  ;;  %v1317_v30 = vld [vmem:[%s1844_s26 + $0x58] sm:$0xff]  ;;  %v1314_v31 = vld [vmem:[%s1836_s19 + $0x40] sm:$0xff]  ;;  %v1461_v32 = vpack.c.bf16 %v1308_v28, %v1307_v27  ;;  %v398_v43 = vld [vmem:[%s1976_s2 + $0x10] sm:$0xff]  ;;  %s383_s30 = scalar_lea.vmem [#allocation6], %s1295_s27 }
  0x60   : > { %1454 = vmatprep.subr.bf16.mxu1 %v1641_v0  ;;  %1386 = vmatprep.subr.mxu0 %v1643_v1  ;;  %v1467_v33 = vpack.c.bf16 %v1317_v30, %v1316_v29  ;;  %v394_v39 = vld [vmem:[%s391_s25] sm:$0xff]  ;;  %v397_v42 = vld [vmem:[%s1976_s2 + $0x8] sm:$0xf]  ;;  %v399_v44 = vld [vmem:[%s1976_s2 + $0x18] sm:$0xf]  ;;  %s1330_s25 = sshll.u32 (%p1992_p12), %s1709_s9, 2 }
  0x61   : > { %1456 = vmatpush3.bf16.msra.mxu1 %v1455_v16  ;;  %1397 = vmatprep.mubr.msk.f32.mxu1 %vm1642_vm0, %v1643_v1  ;;  %v396_v40 = vld [vmem:[%s1976_s2] sm:$0xff]  ;;  %s1136_s23 = scalar_lea.vmem (%p1992_p12), %s1982_s8, %s1330_s25 }
  0x62   : > { %1395 = vmatprep.subr.mxu1 %v1643_v1  ;;  %1122 = vperm.xlu0 %1535, %v1327_v36   ;;  %v1320_v41 = vld [vmem:[%s1844_s26 + $0x70] sm:$0xf] }
  0x63   : > { %1387 = vmatpush3.msk.msra.mxu0 %vm491_vm2, %v486_v19  ;;  %v395_v48 = vld [vmem:[%s387_s21] sm:$0x7] }
  0x64   : > { %1389 = vmatmul.mubr.msk.f32.vlgmr.msra.gmra.mrb[0].mxu0 %vm487_vm3, %v393_v22  ;;  %1463 = vmatprep.subr.bf16.mxu0 %v1641_v0  ;;  %v480_v49 = vrot.slane %v395_v48, %v479_v47  ;;  %v643_v57 = vrot.slane %v395_v48, %v642_v56  ;;  %v802_v62 = vrot.slane %v395_v48, %v801_v58 }
  0x65   : > { %1396 = vmatpush3.msra.mxu1 %v1303_v25  ;;  %1465 = vmatpush3.bf16.msra.mxu0 %v1464_v23 }
  0x66   : > { %1457 = vmatprep.subr.bf16.mxu1 %v1641_v0  ;;  %1398 = vmatmul.mubr.msk.f32.vlgmr.msra.gmra.mrb[2].mxu1 %vm403_vm1, %v392_v15 }
  0x67   : > { %1459 = vmatpush3.bf16.msra.mxu1 %v1458_v26  ;;  %1417 = vmatprep.subr.mxu0 %v1643_v1 }
  0x68   : > { %1460 = vmatprep.subr.bf16.mxu1 %v1641_v0  ;;  %1419 = vmatprep.mubr.msk.f32.mxu0 %vm1642_vm0, %v1643_v1 }
  0x69   : > { %1418 = vmatpush3.msra.mxu0 %v1314_v31  ;;  %1410 = vmatprep.mubr.msk.f32.mxu1 %vm1642_vm0, %v1643_v1 }
  0x6a   : > { %1466 = vmatprep.subr.bf16.mxu0 %v1641_v0  ;;  %1420 = vmatmul.mubr.msk.f32.vlgmr.msra.gmra.mrb[2].mxu0 %vm403_vm1, %v392_v15 }
  0x6b   : > { %1462 = vmatpush3.bf16.msra.mxu1 %v1461_v32  ;;  %1468 = vmatpush3.bf16.msra.mxu0 %v1467_v33 }
  0x6c   : > { %1408 = vmatprep.subr.mxu1 %v1643_v1  ;;  %1469 = vmatprep.subr.bf16.mxu0 %v1641_v0 }
  0x6d   : > { %1432 = vmatprep.mubr.msk.f32.mxu0 %vm1642_vm0, %v1643_v1 }
  0x6f   : > { %1409 = vmatpush3.msk.msra.mxu1 %vm491_vm2, %v1309_v38  ;;  %1471 = vmatpush3.bf16.msra.mxu0 %v1470_v37 }
  0x70   : > { %1411 = vmatmul.mubr.msk.f32.vlgmr.msra.gmra.mrb[2].mxu1 %vm487_vm3, %v393_v22  ;;  %1435 = vmatprep.subr.mxu1 %v394_v39 }
  0x71   : > { %1436 = vmatpush3.msra.mxu1 %v394_v39  ;;  %1430 = vmatprep.subr.mxu0 %v1643_v1 }
  0x72   : > { %1437 = vmatprep.mubr.msk.f32.mxu1 %vm884_vm4, %v396_v40  ;;  %1440 = vmatprep.subr.mxu1 %v394_v39 }
  0x73   : > { %1431 = vmatpush3.msk.msra.mxu0 %vm491_vm2, %v1320_v41 }
  0x74   : > { %1433 = vmatmul.mubr.msk.f32.vlgmr.msra.gmra.mrb[2].mxu0 %vm487_vm3, %v393_v22  ;;  %1438 = vmatmul.mubr.msk.f32.vlgmr.msra.gmra.mrb[4].mxu1 %vm884_vm4, %v397_v42 }
  0x75   : > { %1441 = vmatpush3.msra.mxu1 %v394_v39  ;;  %1442 = vmatprep.mubr.msk.f32.mxu1 %vm884_vm4, %v398_v43 }
  0x78   : > { %1443 = vmatmul.mubr.msk.f32.vlgmr.msra.gmra.mrb[6].mxu1 %vm884_vm4, %v399_v44 }
  0xdd   : > { %v1002_v27 = vpop.permute.xlu0 %1001 }
  0xe1   : > { %v1123_v38 = vpop.permute.xlu0 %1122 }
 0x132   : > { %v473_v50 = vpop.f32.mrb[0].mxu1 }
 0x133   : > { %v481_v51 = vadd.f32 %v480_v49, %v473_v50  ;;  %v1377_v52 = vpop.f32.mrb[1].mxu1 }
 0x137   : > { %v561_v53 = vpop.f32.mrb[0].mxu0 }
 0x138   : > { %v565_v54 = vadd.f32 %v561_v53, %v481_v51  ;;  %v1390_v55 = vpop.f32.mrb[1].mxu0 }
 0x13a   : > { %v969_v0 = vrot.slane %v565_v54, %v479_v47  ;;  %v1090_v10 = vrot.slane %v565_v54, %v642_v56 }
 0x143   : > { %v720_v59 = vpop.f32.mrb[2].mxu1 }
 0x144   : > { %v1474_v60 = vadd.f32 %v720_v59, %v643_v57  ;;  %v1412_v61 = vpop.f32.mrb[3].mxu1 }
 0x146   : > { %v974_v63 = vrot.slane %v1474_v60, %v479_v47  ;;  %v1095_v11 = vrot.slane %v1474_v60, %v642_v56 }
 0x147   : > { %v879_v1 = vpop.f32.mrb[2].mxu0  ;;  %v1439_v2 = vpop.f32.mrb[4].mxu1 }
 0x148   : > { %v1475_v3 = vadd.f32 %v879_v1, %v802_v62  ;;  %v1434_v4 = vpop.f32.mrb[3].mxu0  ;;  %v957_v5 = vpop.f32.mrb[5].mxu1  ;;  %v995_v29 = vrot.slane %v1439_v2, 1 }
 0x149   : > { %v970_v6 = vmul.f32 %v969_v0, %v957_v5  ;;  %v975_v7 = vmul.f32 %v974_v63, %v957_v5 }
 0x14a   : > { %v983_v8 = vrot.slane %v1475_v3, %v479_v47  ;;  %v1104_v9 = vrot.slane %v1475_v3, %v642_v56 }
 0x14b   : > { %v977_v12 = vrot.slane %v975_v7, 3  ;;  %v1444_v13 = vpop.f32.mrb[6].mxu1 }
 0x14c   : > { %v985_v14 = vmul.f32 %v1439_v2, %v983_v8  ;;  %v984_v15 = vmul.f32 %v983_v8, %v957_v5  ;;  %v1106_v16 = vmul.f32 %v1444_v13, %v1104_v9  ;;  %v1078_v17 = vpop.f32.mrb[7].mxu1  ;;  %v1115_v33 = vrot.slane %v1444_v13, 1 }
 0x14d   : > { %v979_v18 = vadd.f32 %v977_v12, %v970_v6  ;;  %v1091_v19 = vmul.f32 %v1090_v10, %v1078_v17  ;;  %v1096_v20 = vmul.f32 %v1095_v11, %v1078_v17  ;;  %v1105_v21 = vmul.f32 %v1104_v9, %v1078_v17 }
 0x14e   : > { %v990_v22 = vrot.slane %v985_v14, 6  ;;  %v989_v23 = vrot.slane %v984_v15, 6  ;;  %v1110_v24 = vrot.slane %v1106_v16, 6 }
 0x14f   : > { %v1098_v25 = vrot.slane %v1096_v20, 3  ;;  %v1109_v26 = vrot.slane %v1105_v21, 6 }
 0x150   : > { %v991_v28 = vsel %vm988_vm5, %v989_v23, %v990_v22 }
 0x151   : > { %v1100_v30 = vadd.f32 %v1098_v25, %v1091_v19  ;;  %v993_v31 = vadd.f32 %v991_v28, %v979_v18  ;;  %v1111_v32 = vsel %vm988_vm5, %v1109_v26, %v1110_v24 }
 0x153   : > { %v997_v34 = vadd.f32 %v995_v29, %v993_v31  ;;  %v1113_v35 = vadd.f32 %v1111_v32, %v1100_v30  ;;  %1134 = sbr.rel (!%p1992_p12) target bundleno = 354 (0x162), region = 64 }
 0x155   : > { %v1004_v36 = vadd.f32 %v1002_v27, %v997_v34  ;;  %v1117_v37 = vadd.f32 %v1115_v33, %v1113_v35 }
 0x157   : > { %1005 = vst [vmem:[%s383_s30] sm:$0x7] %v1004_v36  ;;  %v1125_v39 = vadd.f32 %v1123_v38, %v1117_v37 }
 0x159   : > { %1328 = vst [vmem:[%s383_s30 + $0x4] sm:$0x7] %v1125_v39 }
 0x15e   : > { %v1152_v40 = vld [vmem:[%s383_s30] sm:$0xf] }
 0x15f   : > { %1153 = vst [vmem:[%s1136_s23] sm:$0xf] %v1152_v40 }
 0x160   : > { %v1154_v41 = vld [vmem:[%s383_s30 + $0x4] sm:$0xf] }
 0x161   : > { %1155 = vst [vmem:[%s1136_s23 + $0xc] sm:$0xf] %v1154_v41 }
 0x162 PF: > { %s1993_s19 = sld [smem:[#allocation9_spill]]  ;;  %p21_p4 = scmp.ge.s32.totalorder %s1712_s10, 5  }
 0x163   : > { %s1994_s27 = smov %s1626_s28  ;;  %s1995_s28 = smov %s1630_s29 }
 0x164   : > { %s1997_s30 = smov %s1712_s10  ;;  %23 = sbr.rel (!%p21_p4) target bundleno = 7 (0x7), region = 158 }
 0x168   : > { %s1996_s29 = smov %s1993_s19 }
 0x16b   :  { %1192 = vsyncpa [#allocation3], 1 }
 0x16c   :  { %1194 = vsyncpa [#allocation3 + $0x1], 1 }
 0x16d   :  { %1195 = vsyncpa [#allocation5], 1 }
 0x16e   :  { %1197 = vsyncpa [#allocation5 + $0x1], 1 }

</bundles_post_ra>
